<compile_context>
chip_gen: v7x
topology: tpu7x:2x2x1
jax: 0.10.0
libtpu: 0.0.40
codegen_flags: <defaults>
</compile_context>

<pallas_src>
import functools

import jax
import jax.numpy as jnp
from jax import lax
from jax.experimental import pallas as pl
from jax.experimental.pallas import tpu as pltpu

P = 1.5        # Tweedie power (fixed; exploited analytically below)
EPS = 1e-9
COEFF = 0.01


def _reference(logits: jax.Array, y_true: jax.Array) -> jax.Array:
    """Pure-JAX mirror of the PyTorch forward (also the small-batch path)."""
    logits = logits.astype(jnp.float32)
    y_true = y_true.astype(jnp.float32)
    gamma = logits[:, 0:1]
    nu = logits[:, 1:2]
    beta = logits[:, 3:4]
    term1 = -y_true * (jnp.power(gamma, 1.0 - P) / (1.0 - P))
    term2 = jnp.power(gamma, 2.0 - P) / (2.0 - P)
    tweedie = term1 + term2
    var = beta / (nu + EPS)
    loss = jnp.log(var) + (1.0 + COEFF * nu) * tweedie / var
    return jnp.mean(loss)


def _make_kernel(batch: int, block_rows: int, pad: int):
    n8 = block_rows // 8

    def kernel(params_ref, y_ref, out_ref):
        i = pl.program_id(0)

        gamma = params_ref[0].astype(jnp.float32)   # (block_rows, 128)
        nu = params_ref[1].astype(jnp.float32)
        beta = params_ref[2].astype(jnp.float32)
        y = y_ref[...].astype(jnp.float32)

        # Tweedie deviance at p = 1.5:
        #   -y*gamma^(-.5)/(-.5) + gamma^(.5)/(.5) = 2*rsqrt(gamma)*(y+gamma)
        # (gamma/nu/beta/y assumed positive, same as the torch module.)
        r = lax.rsqrt(gamma)                         # single EUP push / vreg
        tweedie = 2.0 * r * (y + gamma)

        inv_var = (nu + EPS) / beta                  # one divide, no reciprocal
        loss = (1.0 + COEFF * nu) * tweedie * inv_var - jnp.log(inv_var)

        def write(l):
            # Per-block partial sum as a full (8,128) vreg: pure VPU adds
            # (the reshape keeps the natural (8,128) tiling, so it is free).
            out_ref[0] = jnp.sum(l.reshape(n8, 8, 128), axis=0)

        if pad == 0:
            write(loss)
        else:
            last = pl.num_programs(0) - 1

            @pl.when(i != last)
            def _hot():
                write(loss)

            @pl.when(i == last)
            def _tail():
                # batch index of element (row, lane) in this block
                row = lax.broadcasted_iota(jnp.int32, loss.shape, 0)
                lane = lax.broadcasted_iota(jnp.int32, loss.shape, 1)
                idx = (i * block_rows + row) * 128 + lane
                write(jnp.where(idx < batch, loss, 0.0))

    return kernel


@functools.partial(jax.jit, static_argnames=("block_rows", "min_kernel_batch"))
def evidential_tweedie_nll(logits: jax.Array, y_true: jax.Array, *,
                           block_rows: int = 1024,
                           min_kernel_batch: int = 65536) -> jax.Array:
    """logits: (B, 4) = [gamma, nu, alpha, beta]; y_true: (B, 1). Returns scalar."""
    batch = logits.shape[0]
    assert block_rows % 8 == 0

    # Kernel launch + relayout isn't worth it for small batches.
    if batch < min_kernel_batch:
        return _reference(logits, y_true)

    # Stream bf16 inputs as bf16 (half the HBM bytes); everything else as f32.
    compute_dtype = jnp.bfloat16 if logits.dtype == jnp.bfloat16 else jnp.float32

    # Lane-dense relayout; the unused alpha channel is dropped before DMA.
    lt = logits.astype(compute_dtype).T                      # (4, B)
    params = jnp.concatenate([lt[0:2], lt[3:4]], axis=0)     # (3, B): gamma, nu, beta
    y = y_true.astype(compute_dtype).reshape(batch)          # (B,)

    block_elems = block_rows * 128
    num_blocks = pl.cdiv(batch, block_elems)
    padded = num_blocks * block_elems
    pad = padded - batch
    if pad:
        # Benign positive pad values; padded lanes are masked in-kernel.
        params = jnp.pad(params, ((0, 0), (0, pad)), constant_values=1.0)
        y = jnp.pad(y, ((0, pad),), constant_values=1.0)

    total_rows = padded // 128
    params = params.reshape(3, total_rows, 128)
    y = y.reshape(total_rows, 128)

    itemsize = jnp.dtype(compute_dtype).itemsize
    step_in_bytes = 4 * block_rows * 128 * itemsize           # 3 params + y per step
    vmem_limit = int(min(64 << 20, max(32 << 20, 2 * step_in_bytes + (4 << 20))))

    partials = pl.pallas_call(
        _make_kernel(batch, block_rows, pad),
        out_shape=jax.ShapeDtypeStruct((num_blocks, 8, 128), jnp.float32),
        grid_spec=pltpu.PrefetchScalarGridSpec(
            num_scalar_prefetch=0,
            grid=(num_blocks,),
            in_specs=[
                pl.BlockSpec((3, block_rows, 128), lambda i: (0, i, 0)),
                pl.BlockSpec((block_rows, 128), lambda i: (i, 0)),
            ],
            out_specs=pl.BlockSpec((1, 8, 128), lambda i: (i, 0, 0)),
        ),
        compiler_params=pltpu.CompilerParams(
            dimension_semantics=("parallel",),      # no loop carry -> megacore-friendly
            vmem_limit_bytes=vmem_limit),
    )(params, y)

    return jnp.sum(partials) / batch               # mean over the TRUE batch


if __name__ == "__main__":
    key = jax.random.PRNGKey(0)
    k_logits, k_y = jax.random.split(key)

    # Evidential parameters (gamma, nu, alpha, beta) and targets are positive,
    # matching the implicit assumption of the PyTorch module.
    # B deliberately NOT a multiple of a block: exercises padding + tail mask.
    B = 2500
    logits = jax.random.uniform(k_logits, (B, 4), jnp.float32, minval=0.1, maxval=2.0)
    y_true = jax.random.uniform(k_y, (B, 1), jnp.float32, minval=0.1, maxval=3.0)

    # Small demo blocks (block_rows=8 -> 1024 elements/block -> 3-step grid);
    # min_kernel_batch=0 forces the kernel path despite the small batch.
    # Production large-B should use the defaults (block_rows=1024+).
    loss = evidential_tweedie_nll(logits, y_true, block_rows=8, min_kernel_batch=0)
    loss = jax.block_until_ready(loss)

    ref = jax.block_until_ready(_reference(logits, y_true))
    assert jnp.allclose(loss, ref, rtol=1e-5, atol=1e-4), (loss, ref)

    print("KERNEL_OK")
</pallas_src>

<mosaic_0001>
module attributes {stable_mosaic.version = 11 : i64} {
  func.func @kernel(%arg0: i32, %arg1: memref<3x8x128xf32, #tpu.memory_space<vmem>>, %arg2: memref<8x128xf32, #tpu.memory_space<vmem>>, %arg3: memref<1x8x128xf32, #tpu.memory_space<vmem>>) attributes {dimension_semantics = [#tpu.dimension_semantics<parallel>], iteration_bounds = array<i64: 3>, scalar_prefetch = 0 : i64, scratch_operands = 0 : i64, tpu.core_type = #tpu.core_type<tc>, window_params = [{transform_indices = @transform_0, window_bounds = array<i64: 3, 8, 128>}, {transform_indices = @transform_1, window_bounds = array<i64: 8, 128>}, {transform_indices = @transform_2, window_bounds = array<i64: 1, 8, 128>}]} {
    %c0 = arith.constant 0 : index
    %c0_0 = arith.constant 0 : index
    %c0_1 = arith.constant 0 : index
    %0 = vector.load %arg1[%c0, %c0_0, %c0_1] : memref<3x8x128xf32, #tpu.memory_space<vmem>>, vector<1x8x128xf32>
    %1 = vector.shape_cast %0 : vector<1x8x128xf32> to vector<8x128xf32>
    %c1 = arith.constant 1 : index
    %c0_2 = arith.constant 0 : index
    %c0_3 = arith.constant 0 : index
    %2 = vector.load %arg1[%c1, %c0_2, %c0_3] : memref<3x8x128xf32, #tpu.memory_space<vmem>>, vector<1x8x128xf32>
    %3 = vector.shape_cast %2 : vector<1x8x128xf32> to vector<8x128xf32>
    %c2 = arith.constant 2 : index
    %c0_4 = arith.constant 0 : index
    %c0_5 = arith.constant 0 : index
    %4 = vector.load %arg1[%c2, %c0_4, %c0_5] : memref<3x8x128xf32, #tpu.memory_space<vmem>>, vector<1x8x128xf32>
    %5 = vector.shape_cast %4 : vector<1x8x128xf32> to vector<8x128xf32>
    %c0_6 = arith.constant 0 : index
    %c0_7 = arith.constant 0 : index
    %6 = vector.load %arg2[%c0_6, %c0_7] : memref<8x128xf32, #tpu.memory_space<vmem>>, vector<8x128xf32>
    %7 = math.rsqrt %1 : vector<8x128xf32>
    %cst = arith.constant 2.000000e+00 : f32
    %8 = vector.broadcast %cst : f32 to vector<8x128xf32>
    %9 = arith.mulf %8, %7 : vector<8x128xf32>
    %10 = arith.addf %6, %1 : vector<8x128xf32>
    %11 = arith.mulf %9, %10 : vector<8x128xf32>
    %cst_8 = arith.constant 9.99999971E-10 : f32
    %12 = vector.broadcast %cst_8 : f32 to vector<8x128xf32>
    %13 = arith.addf %3, %12 : vector<8x128xf32>
    %14 = arith.divf %13, %5 : vector<8x128xf32>
    %cst_9 = arith.constant 0.00999999977 : f32
    %15 = vector.broadcast %cst_9 : f32 to vector<8x128xf32>
    %16 = arith.mulf %15, %3 : vector<8x128xf32>
    %cst_10 = arith.constant 1.000000e+00 : f32
    %17 = vector.broadcast %cst_10 : f32 to vector<8x128xf32>
    %18 = arith.addf %17, %16 : vector<8x128xf32>
    %19 = arith.mulf %18, %11 : vector<8x128xf32>
    %20 = arith.mulf %19, %14 : vector<8x128xf32>
    %21 = math.log %14 : vector<8x128xf32>
    %22 = arith.subf %20, %21 : vector<8x128xf32>
    %c2_i32 = arith.constant 2 : i32
    %23 = arith.cmpi ne, %arg0, %c2_i32 : i32
    %24 = arith.extui %23 : i1 to i32
    %c0_i32 = arith.constant 0 : i32
    %25 = arith.cmpi ne, %24, %c0_i32 : i32
    scf.if %25 {
      %29 = vector.shape_cast %22 : vector<8x128xf32> to vector<1x8x128xf32>
      %cst_13 = arith.constant dense<0.000000e+00> : vector<8x128xf32>
      %30 = vector.multi_reduction <add>, %29, %cst_13 [0] : vector<1x8x128xf32> to vector<8x128xf32>
      %c0_14 = arith.constant 0 : index
      %c0_15 = arith.constant 0 : index
      %c0_16 = arith.constant 0 : index
      %31 = vector.load %arg3[%c0_14, %c0_15, %c0_16] : memref<1x8x128xf32, #tpu.memory_space<vmem>>, vector<1x8x128xf32>
      %32 = vector.shape_cast %31 : vector<1x8x128xf32> to vector<8x128xf32>
      %33 = vector.shape_cast %30 : vector<8x128xf32> to vector<1x8x128xf32>
      tpu.vector_store %arg3[%c0_14, %c0_15, %c0_16], %33 {strides = array<i32>} : memref<1x8x128xf32, #tpu.memory_space<vmem>>, vector<1x8x128xf32>,
    } else {
    }
    %c2_i32_11 = arith.constant 2 : i32
    %26 = arith.cmpi eq, %arg0, %c2_i32_11 : i32
    %27 = arith.extui %26 : i1 to i32
    %c0_i32_12 = arith.constant 0 : i32
    %28 = arith.cmpi ne, %27, %c0_i32_12 : i32
    scf.if %28 {
      %29 = tpu.iota {dimensions = array<i32: 0>} : vector<8x128xi32>
      %30 = tpu.iota {dimensions = array<i32: 1>} : vector<8x128xi32>
      %c8_i32 = arith.constant 8 : i32
      %31 = arith.muli %arg0, %c8_i32 : i32
      %32 = vector.broadcast %31 : i32 to vector<8x128xi32>
      %33 = arith.addi %32, %29 : vector<8x128xi32>
      %c128_i32 = arith.constant 128 : i32
      %34 = vector.broadcast %c128_i32 : i32 to vector<8x128xi32>
      %35 = arith.muli %33, %34 : vector<8x128xi32>
      %36 = arith.addi %35, %30 : vector<8x128xi32>
      %c2500_i32 = arith.constant 2500 : i32
      %37 = vector.broadcast %c2500_i32 : i32 to vector<8x128xi32>
      %38 = arith.cmpi slt, %36, %37 : vector<8x128xi32>
      %cst_13 = arith.constant 0.000000e+00 : f32
      %39 = vector.broadcast %cst_13 : f32 to vector<8x128xf32>
      %40 = arith.select %38, %22, %39 : vector<8x128xi1>, vector<8x128xf32>
      %41 = vector.shape_cast %40 : vector<8x128xf32> to vector<1x8x128xf32>
      %cst_14 = arith.constant dense<0.000000e+00> : vector<8x128xf32>
      %42 = vector.multi_reduction <add>, %41, %cst_14 [0] : vector<1x8x128xf32> to vector<8x128xf32>
      %c0_15 = arith.constant 0 : index
      %c0_16 = arith.constant 0 : index
      %c0_17 = arith.constant 0 : index
      %43 = vector.load %arg3[%c0_15, %c0_16, %c0_17] : memref<1x8x128xf32, #tpu.memory_space<vmem>>, vector<1x8x128xf32>
      %44 = vector.shape_cast %43 : vector<1x8x128xf32> to vector<8x128xf32>
      %45 = vector.shape_cast %42 : vector<8x128xf32> to vector<1x8x128xf32>
      tpu.vector_store %arg3[%c0_15, %c0_16, %c0_17], %45 {strides = array<i32>} : memref<1x8x128xf32, #tpu.memory_space<vmem>>, vector<1x8x128xf32>,
    } else {
    }
    return
  }
  func.func @transform_0(%arg0: i32) -> (i32, i32, i32) {
    %c0_i32 = arith.constant 0 : i32
    %c0_i32_0 = arith.constant 0 : i32
    %c0_i32_1 = arith.constant 0 : i32
    return %c0_i32, %arg0, %c0_i32_0 : i32, i32, i32
  }
  func.func @transform_1(%arg0: i32) -> (i32, i32) {
    %c0_i32 = arith.constant 0 : i32
    %c0_i32_0 = arith.constant 0 : i32
    return %arg0, %c0_i32 : i32, i32
  }
  func.func @transform_2(%arg0: i32) -> (i32, i32, i32) {
    %c0_i32 = arith.constant 0 : i32
    %c0_i32_0 = arith.constant 0 : i32
    %c0_i32_1 = arith.constant 0 : i32
    return %arg0, %c0_i32, %c0_i32_0 : i32, i32, i32
  }
}

</mosaic_0001>

<bundles_post_ra>
// kernel: evidential_tweedie_nll.1
= control target key start
LH: loop header
LB: loop body
LE: loop exit
PB: predicated region body
PF: predicated region fallthrough
CT: control target
= control target key end

     0   :  { %s401_s9 = smov 0   ;;  %s403_s10 = smov 0   ;;  %s455_s0 = inlined_call_operand.vmem [shape: f32[3,24,128], index: 0, kind: input, shape index: {}]   ;;  %s456_s1 = inlined_call_operand.vmem [shape: f32[24,128], index: 1, kind: input, shape index: {}]   ;;  %s457_s2 = inlined_call_operand.vmem [shape: f32[3,8,128], index: 2, kind: output, shape index: {}]  }
   0x1   :  { %s405_s11 = smov 0  }
   0x2 LB: > { %s414_s12 = sadd.s32 4294967295, %s384_s11   ;;  %s416_s13 = sadd.s32 1, %s384_s11   ;;  %s384_s11 = sphi %s405_s11, %s460_s11   ;;  %s380_s10 = sphi %s403_s10, %s459_s10   ;;  %s376_s9 = sphi %s401_s9, %s458_s9  }
   0x3   : > { %s16_s14 = ssub.s32 %s384_s11, %s416_s13  ;;  %s19_s15 = sadd.s32 1, %s380_s10 }
   0x4   : > { %p17_p0 = scmp.eq.s32.totalorder %s16_s14, 0  ;;  %p26_p1 = scmp.ne.s32.totalorder %s380_s10, %s376_s9 }
   0x5   : > { %p27_p2 = scmp.eq.s32.totalorder %s384_s11, 0  ;;  %p318_p4 = scmp.ge.s32.totalorder %s384_s11, 3 }
   0x6   : > { %s423_s16 = scalar_select %p17_p0, %s380_s10, %s19_s15  }
   0x7   : > { %p28_p3 = por %p27_p2, %p26_p1  ;;  %104 = sbr.rel (%p318_p4) target bundleno = 21 (0x15), region = 16 }
   0xe   : > { %107 = sbr.rel (!%p28_p3) target bundleno = 21 (0x15), region = 20  ;;  %s109_s17 = sand.u32 (%p28_p3), 1, %s380_s10  }
   0xf   : > { %s319_s18 = sshll.u32 (%p28_p3), %s384_s11, 3  ;;  %s330_s19 = smul.u32 (%p28_p3), 24, %s109_s17 }
  0x10   : > { %s113_s22 = scalar_lea.vmem (%p28_p3), %s455_s0, %s319_s18 }
  0x11   : > { %v145_v0 = vld [vmem:[%s113_s22] sm:$0xff] (%p28_p3)  ;;  %v147_v1 = vld [vmem:[%s113_s22 + $0x18] sm:$0xff] (%p28_p3)  ;;  %v149_v2 = vld [vmem:[%s113_s22 + $0x30] sm:$0xff] (%p28_p3)  ;;  %s111_s23 = scalar_lea.vmem (%p28_p3), [#allocation2], %s330_s19 }
  0x12   : > { %146 = vst [vmem:[%s111_s23] sm:$0xff] (%p28_p3), %v145_v0  ;;  %148 = vst [vmem:[%s111_s23 + $0x8] sm:$0xff] (%p28_p3), %v147_v1 }
  0x13   : > { %150 = vst [vmem:[%s111_s23 + $0x10] sm:$0xff] (%p28_p3), %v149_v2 }
  0x15 PF: > { %p320_p5 = scmp.ge.s32.totalorder %s384_s11, 1  ;;  %p162_p6 = scmp.lt.s32.totalorder %s384_s11, 4 }
  0x17   : > { %p163_p7 = pnand %p320_p5, %p162_p6 }
  0x18   : > { %s169_s24 = sand.u32 (!%p163_p7), 1, %s376_s9   ;;  %p193_p8 = scmp.lt.s32.totalorder (!%p163_p7), %s414_s12, 2 }
  0x19   : > { %166 = sbr.rel (%p163_p7) target bundleno = 74 (0x4a), region = 62  ;;  %p325_p9 = scmp.eq.s32.totalorder (!%p163_p7), %s414_s12, 2 }
  0x1a   : > { %s331_s25 = smul.u32 (!%p163_p7), 24, %s169_s24 }
  0x1c   : > { %s171_s28 = scalar_lea.vmem (!%p163_p7), [#allocation2], %s331_s25 }
  0x1d   : > { %v201_v3 = vld [vmem:[%s171_s28] sm:$0xff] (!%p163_p7)  ;;  %v324_v4 = vld [vmem:[%s171_s28 + $0x10] sm:$0xff] (!%p163_p7)  ;;  %v323_v5 = vld [vmem:[%s171_s28 + $0x8] sm:$0xff] (!%p163_p7) }
  0x1e   : > { %356 = vrsqrt.f32 (!%p163_p7), %v201_v3  ;;  %v211_v7 = vadd.f32 (!%p163_p7), 1e-09, %v323_v5  ;;  %v214_v12 = vmul.f32 (!%p163_p7), 0.01, %v323_v5 }
  0x1f   : > { %358 = vrcp.f32 (!%p163_p7), %v324_v4 }
  0x20   : > { %s194_s26 = scalar_select %p193_p8, %s414_s12, 2  ;;  %v215_v15 = vadd.f32 1.0, %v214_v12 }
  0x22   : > { %s321_s27 = sshll.u32 %s194_s26, 3 }
  0x23   : > { %s435_s3 = scalar_lea.vmem %s457_s2, %s321_s27  ;;  %s196_s6 = scalar_lea.vmem %s456_s1, %s321_s27 }
  0x24   : > { %v206_v6 = vld [vmem:[%s196_s6] sm:$0xff] }
  0x25   : > { %v209_v11 = vadd.f32 %v206_v6, %v201_v3 }
  0x28   : > { %v357_v8 = vpop.eup %356 }
  0x29   : > { %v359_v9 = vpop.eup %358  ;;  %v208_v10 = vmul.f32 2.0, %v357_v8 }
  0x2a   : > { %v213_v13 = vmul.f32 %v359_v9, %v211_v7 }
  0x2b   : > { %v210_v14 = vmul.f32 %v209_v11, %v208_v10 }
  0x2c   : > { %360 = vlog2.f32 %v213_v13 }
  0x2d   : > { %v216_v16 = vmul.f32 %v215_v15, %v210_v14 }
  0x2f   : > { %v217_v17 = vmul.f32 %v216_v16, %v213_v13 }
  0x33   : > { %224 = sbr.rel (%p325_p9) target bundleno = 60 (0x3c), region = 70 }
  0x36   : > { %v361_v18 = vpop.eup %360 }
  0x37   : > { %v219_v19 = vmul.f32 0.6931472, %v361_v18 }
  0x39   : > { %v220_v20 = vsub.f32 %v217_v17, %v219_v19 }
  0x3b   : > { %226 = vst [vmem:[%s435_s3] sm:$0xff] %v220_v20 }
  0x3c PF: > { %p326_p10 = scmp.ne.s32.totalorder %s414_s12, 2 }
  0x3d   : > { %v231_v21 = vlaneseq (!%p326_p10)  ;;  %s327_s7 = sshll.u32 (!%p326_p10), %s414_s12, 3 }
  0x3e   : > { %230 = sbr.rel (%p326_p10) target bundleno = 74 (0x4a), region = 74  ;;  %v236_v22 = vstv (!%p326_p10), %s327_s7 }
  0x3f   : > { %v232_v23 = vshrl.u32 (!%p326_p10), %v231_v21, 7  ;;  %v234_v24 = vand.u32 (!%p326_p10), 127, %v231_v21 }
  0x41   : > { %v237_v25 = vadd.s32 (!%p326_p10), %v236_v22, %v232_v23 }
  0x43   : > { %v238_v26 = vmul.u32 (!%p326_p10), 128, %v237_v25 }
  0x45   : > { %v239_v27 = vadd.s32 %v238_v26, %v234_v24 }
  0x47   : > { %vm240_vm0 = vcmp.lt.s32.totalorder %v239_v27, 2500 }
  0x48   : > { %v241_v28 = vsel %vm240_vm0, %v220_v20, 0.0 }
  0x49   : > { %243 = vst [vmem:[%s435_s3] sm:$0xff] %v241_v28 }
  0x4a PF: > { %p9_p11 = scmp.ge.s32.totalorder %s416_s13, 5   ;;  %s458_s9 = smov %s380_s10 }
  0x4b   : > { %s459_s10 = smov %s423_s16  ;;  %s460_s11 = smov %s416_s13 }
  0x4c   :  { %11 = sbr.rel (!%p9_p11) target bundleno = 2 (0x2), region = 114 }

</bundles_post_ra>
